<compile_context>
chip_gen: v5e
topology: v5e:2x2
jax: 0.10.0
libtpu: 0.0.40
codegen_flags: <defaults>
</compile_context>

<pallas_src>
import functools

import jax
import jax.numpy as jnp
from jax.experimental import pallas as pl
from jax.experimental.pallas import tpu as pltpu

OBS_DIM = 4
NUM_HIDDEN = 128
ACTION_DIM = 2
CHUNK = 128  # lanes processed per inner step; h_chunk = [128, 128] = 16 vregs


def nn_policy_kernel(xT_ref, w1rep_ref, b1rep_ref, w2d_ref, b2d_ref, outT_ref):
    # xT:    [4, TILE]         states, batch on lanes
    # w1rep: [4, 128, 128]     w1rep[k, j, :] == w1[j, k]   (lane-replicated, resident)
    # b1rep: [128, 128]        b1 lane-replicated            (resident)
    # w2d:   [1, 128]          w2[1,:] - w2[0,:]             (resident)
    # b2d:   [1, 1]            b2[1] - b2[0]                 (resident)
    # outT:  [1, TILE]         p(action=1) per batch lane
    tile = xT_ref.shape[1]
    n_chunks = tile // CHUNK

    w2d = w2d_ref[...]                      # [1, 128]; single vreg, lives across the loop
    b2d = b2d_ref[...]                      # [1, 1]

    # Unrolled chunk loop: every intermediate dies at the store, keeping vreg pressure low.
    for c in range(n_chunks):
        lo = c * CHUNK

        # ---- layer 1 + ReLU on the VPU (K=4 is far too shallow for the MXU) ----
        # h[j, b] = b1[j] + sum_k w1[j, k] * x[b, k]; w1/b1 come pre-replicated from VMEM (vld),
        # the [1, CHUNK] state row is a cheap sublane-splat broadcast.
        h = b1rep_ref[...] + w1rep_ref[0] * xT_ref[0:1, lo:lo + CHUNK]
        for k in range(1, OBS_DIM):
            h = h + w1rep_ref[k] * xT_ref[k:k + 1, lo:lo + CHUNK]
        h = jnp.maximum(h, 0.0)                                           # [128, CHUNK]

        # ---- layer 2 on the (otherwise idle) MXU: with 2 actions only the logit diff matters,
        #      softmax([l0, l1])[1] == sigmoid(l1 - l0)
        d = jnp.dot(w2d, h, preferred_element_type=jnp.float32) + b2d     # [1, CHUNK]

        # numerically stable sigmoid; exp goes to the EUP slot, exact divide keeps 1e-5 accuracy.
        e = jnp.exp(-jnp.abs(d))
        p_hi = 1.0 / (1.0 + e)
        p1 = jnp.where(d >= 0.0, p_hi, e * p_hi)

        outT_ref[:, lo:lo + CHUNK] = p1.astype(outT_ref.dtype)


@functools.partial(jax.jit, static_argnames=("b_tile",))
def nn_policy_forward(states, w1, b1, w2, b2, *, b_tile=2048):
    """Forward pass of NNPolicy.

    states: [B, 4] float32
    w1: [128, 4], b1: [128], w2: [2, 128], b2: [2]   (PyTorch nn.Linear layouts)
    returns: action probabilities [B, 2] float32
    """
    B = states.shape[0]

    # ---- tile selection: lane dim always a multiple of 128; keep >=2 grid steps when B allows
    #      so v7x's two TensorCores both get a "parallel" tile (harmless on v5e/v6e).
    b_tile = max(CHUNK, (int(b_tile) // CHUNK) * CHUNK)
    g = pl.cdiv(B, CHUNK)                       # number of 128-lane batch groups
    groups_per_tile = min(b_tile // CHUNK, g)
    if g >= 2:
        groups_per_tile = min(groups_per_tile, pl.cdiv(g, 2))
    tile = groups_per_tile * CHUNK
    b_pad = pl.cdiv(B, tile) * tile
    grid_n = b_pad // tile

    # ---- one-time operand prep (XLA layout plumbing, outside the kernel) ----
    xT = states.astype(jnp.float32).T                                   # [4, B], batch on lanes
    if b_pad != B:
        xT = jnp.pad(xT, ((0, 0), (0, b_pad - B)))                      # zero-pad tail tile
    w1f = w1.astype(jnp.float32)                                        # [128, 4]
    # lane-replicated copies so the kernel never re-broadcasts chunk-invariant operands
    w1rep = jnp.broadcast_to(w1f.T[:, :, None], (OBS_DIM, NUM_HIDDEN, CHUNK))   # [4,128,128]
    b1rep = jnp.broadcast_to(b1.astype(jnp.float32)[:, None], (NUM_HIDDEN, CHUNK))  # [128,128]
    w2d = (w2[1, :] - w2[0, :]).reshape(1, NUM_HIDDEN).astype(jnp.float32)      # [1, 128]
    b2d = (b2[1] - b2[0]).reshape(1, 1).astype(jnp.float32)                     # [1, 1]

    p1_row = pl.pallas_call(
        nn_policy_kernel,
        out_shape=jax.ShapeDtypeStruct((1, b_pad), jnp.float32),
        grid_spec=pltpu.PrefetchScalarGridSpec(
            num_scalar_prefetch=0,
            grid=(grid_n,),
            in_specs=[
                pl.BlockSpec((OBS_DIM, tile), lambda i: (0, i)),              # states (pipelined)
                pl.BlockSpec((OBS_DIM, NUM_HIDDEN, CHUNK), lambda i: (0, 0, 0)),  # w1 (resident)
                pl.BlockSpec((NUM_HIDDEN, CHUNK), lambda i: (0, 0)),          # b1 (resident)
                pl.BlockSpec((1, NUM_HIDDEN), lambda i: (0, 0)),              # w2 diff (resident)
                pl.BlockSpec((1, 1), lambda i: (0, 0)),                       # b2 diff (resident)
            ],
            out_specs=pl.BlockSpec((1, tile), lambda i: (0, i)),
        ),
        compiler_params=pltpu.CompilerParams(
            dimension_semantics=("parallel",),   # independent batch tiles -> v7x 2-TC sharding
        ),
    )(xT, w1rep, b1rep, w2d, b2d)

    p1 = p1_row[0, :B]                                                  # prob of action 1
    return jnp.stack([1.0 - p1, p1], axis=-1)                           # [B, 2]


def init_params(key):
    """PyTorch-layout params: l1.weight [128,4], l1.bias [128], l2.weight [2,128], l2.bias [2]."""
    k1, k2, k3, k4 = jax.random.split(key, 4)
    lim1 = 1.0 / (OBS_DIM ** 0.5)
    lim2 = 1.0 / (NUM_HIDDEN ** 0.5)
    w1 = jax.random.uniform(k1, (NUM_HIDDEN, OBS_DIM), jnp.float32, -lim1, lim1)
    b1 = jax.random.uniform(k2, (NUM_HIDDEN,), jnp.float32, -lim1, lim1)
    w2 = jax.random.uniform(k3, (ACTION_DIM, NUM_HIDDEN), jnp.float32, -lim2, lim2)
    b2 = jax.random.uniform(k4, (ACTION_DIM,), jnp.float32, -lim2, lim2)
    return w1, b1, w2, b2


def _reference(states, w1, b1, w2, b2):
    hp = jnp.maximum(
        jnp.dot(states, w1.T, precision=jax.lax.Precision.HIGHEST) + b1, 0.0)
    logits = jnp.dot(hp, w2.T, precision=jax.lax.Precision.HIGHEST) + b2
    return jax.nn.softmax(logits, axis=-1)


if __name__ == "__main__":
    key = jax.random.PRNGKey(0)
    pkey, xkey1, xkey2 = jax.random.split(key, 3)
    w1, b1, w2, b2 = init_params(pkey)

    ok = True
    # small batch (single tile) and a padded multi-tile batch (exercises grid_n >= 2)
    for B, xkey in ((8, xkey1), (300, xkey2)):
        states = jax.random.normal(xkey, (B, OBS_DIM), jnp.float32)
        probs = jax.block_until_ready(nn_policy_forward(states, w1, b1, w2, b2))
        ref = _reference(states, w1, b1, w2, b2)
        assert probs.shape == (B, ACTION_DIM)
        assert float(jnp.max(jnp.abs(probs - ref))) < 1e-5, f"mismatch vs reference (B={B})"
        assert bool(jnp.allclose(jnp.sum(probs, axis=-1), 1.0, atol=1e-6)), "rows must sum to 1"
        ok = ok and True

    if ok:
        print("KERNEL_OK")
</pallas_src>

<mosaic_0001>
module attributes {stable_mosaic.version = 11 : i64} {
  func.func @nn_policy_kernel(%arg0: i32, %arg1: memref<4x128xf32, #tpu.memory_space<vmem>>, %arg2: memref<4x128x128xf32, #tpu.memory_space<vmem>>, %arg3: memref<128x128xf32, #tpu.memory_space<vmem>>, %arg4: memref<1x128xf32, #tpu.memory_space<vmem>>, %arg5: memref<1x1xf32, #tpu.memory_space<vmem>>, %arg6: memref<1x128xf32, #tpu.memory_space<vmem>>) attributes {dimension_semantics = [#tpu.dimension_semantics<parallel>], iteration_bounds = array<i64: 1>, scalar_prefetch = 0 : i64, scratch_operands = 0 : i64, tpu.core_type = #tpu.core_type<tc>, window_params = [{transform_indices = @transform_0, window_bounds = array<i64: 4, 128>}, {pipeline_mode = #tpu.pipeline_mode<synchronous>, transform_indices = @transform_1, window_bounds = array<i64: 4, 128, 128>}, {pipeline_mode = #tpu.pipeline_mode<synchronous>, transform_indices = @transform_2, window_bounds = array<i64: 128, 128>}, {pipeline_mode = #tpu.pipeline_mode<synchronous>, transform_indices = @transform_3, window_bounds = array<i64: 1, 128>}, {pipeline_mode = #tpu.pipeline_mode<synchronous>, transform_indices = @transform_4, window_bounds = array<i64: 1, 1>}, {transform_indices = @transform_5, window_bounds = array<i64: 1, 128>}]} {
    %c0 = arith.constant 0 : index
    %c0_0 = arith.constant 0 : index
    %0 = vector.load %arg4[%c0, %c0_0] : memref<1x128xf32, #tpu.memory_space<vmem>>, vector<1x128xf32>
    %c0_1 = arith.constant 0 : index
    %c0_2 = arith.constant 0 : index
    %1 = vector.load %arg5[%c0_1, %c0_2] : memref<1x1xf32, #tpu.memory_space<vmem>>, vector<1x1xf32>
    %c0_3 = arith.constant 0 : index
    %c0_4 = arith.constant 0 : index
    %2 = vector.load %arg3[%c0_3, %c0_4] : memref<128x128xf32, #tpu.memory_space<vmem>>, vector<128x128xf32>
    %c0_5 = arith.constant 0 : index
    %c0_6 = arith.constant 0 : index
    %c0_7 = arith.constant 0 : index
    %3 = vector.load %arg2[%c0_5, %c0_6, %c0_7] : memref<4x128x128xf32, #tpu.memory_space<vmem>>, vector<1x128x128xf32>
    %4 = vector.shape_cast %3 : vector<1x128x128xf32> to vector<128x128xf32>
    %c0_8 = arith.constant 0 : index
    %c0_9 = arith.constant 0 : index
    %5 = vector.load %arg1[%c0_8, %c0_9] : memref<4x128xf32, #tpu.memory_space<vmem>>, vector<1x128xf32>
    %6 = vector.broadcast %5 : vector<1x128xf32> to vector<128x128xf32>
    %7 = arith.mulf %4, %6 : vector<128x128xf32>
    %8 = arith.addf %2, %7 : vector<128x128xf32>
    %c1 = arith.constant 1 : index
    %c0_10 = arith.constant 0 : index
    %c0_11 = arith.constant 0 : index
    %9 = vector.load %arg2[%c1, %c0_10, %c0_11] : memref<4x128x128xf32, #tpu.memory_space<vmem>>, vector<1x128x128xf32>
    %10 = vector.shape_cast %9 : vector<1x128x128xf32> to vector<128x128xf32>
    %c1_12 = arith.constant 1 : index
    %c0_13 = arith.constant 0 : index
    %11 = vector.load %arg1[%c1_12, %c0_13] : memref<4x128xf32, #tpu.memory_space<vmem>>, vector<1x128xf32>
    %12 = vector.broadcast %11 : vector<1x128xf32> to vector<128x128xf32>
    %13 = arith.mulf %10, %12 : vector<128x128xf32>
    %14 = arith.addf %8, %13 : vector<128x128xf32>
    %c2 = arith.constant 2 : index
    %c0_14 = arith.constant 0 : index
    %c0_15 = arith.constant 0 : index
    %15 = vector.load %arg2[%c2, %c0_14, %c0_15] : memref<4x128x128xf32, #tpu.memory_space<vmem>>, vector<1x128x128xf32>
    %16 = vector.shape_cast %15 : vector<1x128x128xf32> to vector<128x128xf32>
    %c2_16 = arith.constant 2 : index
    %c0_17 = arith.constant 0 : index
    %17 = vector.load %arg1[%c2_16, %c0_17] : memref<4x128xf32, #tpu.memory_space<vmem>>, vector<1x128xf32>
    %18 = vector.broadcast %17 : vector<1x128xf32> to vector<128x128xf32>
    %19 = arith.mulf %16, %18 : vector<128x128xf32>
    %20 = arith.addf %14, %19 : vector<128x128xf32>
    %c3 = arith.constant 3 : index
    %c0_18 = arith.constant 0 : index
    %c0_19 = arith.constant 0 : index
    %21 = vector.load %arg2[%c3, %c0_18, %c0_19] : memref<4x128x128xf32, #tpu.memory_space<vmem>>, vector<1x128x128xf32>
    %22 = vector.shape_cast %21 : vector<1x128x128xf32> to vector<128x128xf32>
    %c3_20 = arith.constant 3 : index
    %c0_21 = arith.constant 0 : index
    %23 = vector.load %arg1[%c3_20, %c0_21] : memref<4x128xf32, #tpu.memory_space<vmem>>, vector<1x128xf32>
    %24 = vector.broadcast %23 : vector<1x128xf32> to vector<128x128xf32>
    %25 = arith.mulf %22, %24 : vector<128x128xf32>
    %26 = arith.addf %20, %25 : vector<128x128xf32>
    %cst = arith.constant 0.000000e+00 : f32
    %27 = vector.broadcast %cst : f32 to vector<128x128xf32>
    %28 = arith.maximumf %26, %27 : vector<128x128xf32>
    %cst_22 = arith.constant dense<0.000000e+00> : vector<1x128xf32>
    %29 = tpu.matmul %0, %28, %cst_22 {dimension_numbers = #tpu.dot_dimension_numbers<[1], [0], [0], [1], [0, 0, 1, 1], [], []>} : vector<1x128xf32>, vector<128x128xf32>, vector<1x128xf32> -> vector<1x128xf32>
    %30 = vector.broadcast %1 : vector<1x1xf32> to vector<1x128xf32>
    %31 = arith.addf %29, %30 : vector<1x128xf32>
    %32 = math.absf %31 : vector<1x128xf32>
    %cst_23 = arith.constant 0.000000e+00 : f32
    %33 = vector.broadcast %cst_23 : f32 to vector<1x128xf32>
    %34 = arith.subf %33, %32 : vector<1x128xf32>
    %35 = math.exp %34 : vector<1x128xf32>
    %cst_24 = arith.constant 1.000000e+00 : f32
    %36 = vector.broadcast %cst_24 : f32 to vector<1x128xf32>
    %37 = arith.addf %36, %35 : vector<1x128xf32>
    %cst_25 = arith.constant 1.000000e+00 : f32
    %38 = vector.broadcast %cst_25 : f32 to vector<1x128xf32>
    %39 = arith.divf %38, %37 : vector<1x128xf32>
    %cst_26 = arith.constant 0.000000e+00 : f32
    %40 = vector.broadcast %cst_26 : f32 to vector<1x128xf32>
    %41 = arith.cmpf oge, %31, %40 : vector<1x128xf32>
    %42 = arith.mulf %35, %39 : vector<1x128xf32>
    %43 = arith.select %41, %39, %42 : vector<1x128xi1>, vector<1x128xf32>
    %c0_27 = arith.constant 0 : index
    %c0_28 = arith.constant 0 : index
    %44 = vector.load %arg6[%c0_27, %c0_28] : memref<1x128xf32, #tpu.memory_space<vmem>>, vector<1x128xf32>
    tpu.vector_store %arg6[%c0_27, %c0_28], %43 {strides = array<i32>} : memref<1x128xf32, #tpu.memory_space<vmem>>, vector<1x128xf32>,
    return
  }
  func.func @transform_0(%arg0: i32) -> (i32, i32) {
    %c0_i32 = arith.constant 0 : i32
    %c0_i32_0 = arith.constant 0 : i32
    return %c0_i32, %arg0 : i32, i32
  }
  func.func @transform_1(%arg0: i32) -> (i32, i32, i32) {
    %c0_i32 = arith.constant 0 : i32
    %c0_i32_0 = arith.constant 0 : i32
    %c0_i32_1 = arith.constant 0 : i32
    %c0_i32_2 = arith.constant 0 : i32
    return %c0_i32, %c0_i32_0, %c0_i32_1 : i32, i32, i32
  }
  func.func @transform_2(%arg0: i32) -> (i32, i32) {
    %c0_i32 = arith.constant 0 : i32
    %c0_i32_0 = arith.constant 0 : i32
    %c0_i32_1 = arith.constant 0 : i32
    return %c0_i32, %c0_i32_0 : i32, i32
  }
  func.func @transform_3(%arg0: i32) -> (i32, i32) {
    %c0_i32 = arith.constant 0 : i32
    %c0_i32_0 = arith.constant 0 : i32
    %c0_i32_1 = arith.constant 0 : i32
    return %c0_i32, %c0_i32_0 : i32, i32
  }
  func.func @transform_4(%arg0: i32) -> (i32, i32) {
    %c0_i32 = arith.constant 0 : i32
    %c0_i32_0 = arith.constant 0 : i32
    %c0_i32_1 = arith.constant 0 : i32
    return %c0_i32, %c0_i32_0 : i32, i32
  }
  func.func @transform_5(%arg0: i32) -> (i32, i32) {
    %c0_i32 = arith.constant 0 : i32
    %c0_i32_0 = arith.constant 0 : i32
    return %c0_i32, %arg0 : i32, i32
  }
}

</mosaic_0001>

<bundles_post_ra>
// kernel: nn_policy_forward.1
= control target key start
LH: loop header
LB: loop body
LE: loop exit
PB: predicated region body
PF: predicated region fallthrough
CT: control target
= control target key end

     0   :  { %s735_s0 = inlined_call_operand.vmem [shape: f32[4,128], index: 0, kind: input, shape index: {}]   ;;  %s736_s1 = inlined_call_operand.vmem [shape: f32[4,128,128], index: 1, kind: input, shape index: {}]   ;;  %s737_s2 = inlined_call_operand.vmem [shape: f32[128,128], index: 2, kind: input, shape index: {}]   ;;  %s738_s4 = inlined_call_operand.<no memory space> [shape: f32[1,1], index: 4, kind: input, shape index: {}]   ;;  %s739_s3 = inlined_call_operand.vmem [shape: f32[1,128], index: 3, kind: input, shape index: {}]   ;;  %s740_s5 = inlined_call_operand.vmem [shape: f32[1,128], index: 5, kind: output, shape index: {}]  }
   0x1   :  { %v39_v0 = vld [vmem:[%s737_s2 + $0x78] sm:$0xff]  ;;  %v411_v2 = vld [vmem:[%s735_s0] ss:$0 sm:$0xff]  ;;  %v419_v4 = vld [vmem:[%s735_s0 + $0x1] ss:$0 sm:$0xff] }
   0x2   :  { %v55_v1 = vld [vmem:[%s736_s1 + $0x78] sm:$0xff]  ;;  %v428_v7 = vld [vmem:[%s735_s0 + $0x2] ss:$0 sm:$0xff]  ;;  %v437_v10 = vld [vmem:[%s735_s0 + $0x3] ss:$0 sm:$0xff] }
   0x3   :  { %v328_v3 = vld [vmem:[%s736_s1 + $0xf8] sm:$0xff]  ;;  %v73_v6 = vmul.f32 %v411_v2, %v55_v1  ;;  %v38_v11 = vld [vmem:[%s737_s2 + $0x70] sm:$0xff]  ;;  %v37_v22 = vld [vmem:[%s737_s2 + $0x68] sm:$0xff] }
   0x4   :  { %v344_v5 = vld [vmem:[%s736_s1 + $0x178] sm:$0xff]  ;;  %v124_v9 = vmul.f32 %v419_v4, %v328_v3  ;;  %v54_v12 = vld [vmem:[%s736_s1 + $0x70] sm:$0xff]  ;;  %v53_v23 = vld [vmem:[%s736_s1 + $0x68] sm:$0xff] }
   0x5   :  { %v360_v8 = vld [vmem:[%s736_s1 + $0x1f8] sm:$0xff]  ;;  %v89_v13 = vadd.f32 %v73_v6, %v39_v0  ;;  %v175_v14 = vmul.f32 %v428_v7, %v344_v5  ;;  %v72_v15 = vmul.f32 %v411_v2, %v54_v12  ;;  %v327_v16 = vld [vmem:[%s736_s1 + $0xf0] sm:$0xff]  ;;  %v326_v24 = vld [vmem:[%s736_s1 + $0xe8] sm:$0xff]  ;;  %v71_v27 = vmul.f32 %v411_v2, %v53_v23 }
   0x6   :  { %v343_v17 = vld [vmem:[%s736_s1 + $0x170] sm:$0xff]  ;;  %v226_v19 = vmul.f32 %v437_v10, %v360_v8  ;;  %v123_v20 = vmul.f32 %v419_v4, %v327_v16  ;;  %v122_v28 = vmul.f32 %v419_v4, %v326_v24  ;;  %v342_v29 = vld [vmem:[%s736_s1 + $0x168] sm:$0xff]  ;;  %v36_v31 = vld [vmem:[%s737_s2 + $0x60] sm:$0xff] }
   0x7   :  { %v359_v18 = vld [vmem:[%s736_s1 + $0x1f0] sm:$0xff]  ;;  %v174_v21 = vmul.f32 %v428_v7, %v343_v17  ;;  %v140_v25 = vadd.f32 %v124_v9, %v89_v13  ;;  %v88_v26 = vadd.f32 %v72_v15, %v38_v11  ;;  %v358_v30 = vld [vmem:[%s736_s1 + $0x1e8] sm:$0xff]  ;;  %v173_v33 = vmul.f32 %v428_v7, %v342_v29  ;;  %v52_v34 = vld [vmem:[%s736_s1 + $0x60] sm:$0xff] }
   0x8   :  { %v225_v32 = vmul.f32 %v437_v10, %v359_v18  ;;  %v325_v35 = vld [vmem:[%s736_s1 + $0xe0] sm:$0xff]  ;;  %v87_v39 = vadd.f32 %v71_v27, %v37_v22  ;;  %v70_v40 = vmul.f32 %v411_v2, %v52_v34  ;;  %v35_v42 = vld [vmem:[%s737_s2 + $0x58] sm:$0xff]  ;;  %v224_v44 = vmul.f32 %v437_v10, %v358_v30  ;;  %v50_v55 = vld [vmem:[%s736_s1 + $0x50] sm:$0xff] }
   0x9   :  { %v341_v36 = vld [vmem:[%s736_s1 + $0x160] sm:$0xff]  ;;  %v191_v37 = vadd.f32 %v175_v14, %v140_v25  ;;  %v139_v38 = vadd.f32 %v123_v20, %v88_v26  ;;  %v51_v43 = vld [vmem:[%s736_s1 + $0x58] sm:$0xff]  ;;  %v121_v45 = vmul.f32 %v419_v4, %v325_v35  ;;  %v323_v56 = vld [vmem:[%s736_s1 + $0xd0] sm:$0xff]  ;;  %v68_v11 = vmul.f32 %v411_v2, %v50_v55 }
   0xa   :  { %v357_v41 = vld [vmem:[%s736_s1 + $0x1e0] sm:$0xff]  ;;  %v172_v46 = vmul.f32 %v428_v7, %v341_v36  ;;  %v69_v47 = vmul.f32 %v411_v2, %v51_v43  ;;  %v324_v48 = vld [vmem:[%s736_s1 + $0xd8] sm:$0xff]  ;;  %v138_v52 = vadd.f32 %v122_v28, %v87_v39  ;;  %v86_v53 = vadd.f32 %v70_v40, %v36_v31  ;;  %v339_v61 = vld [vmem:[%s736_s1 + $0x150] sm:$0xff] }
   0xb   :  { %v340_v49 = vld [vmem:[%s736_s1 + $0x158] sm:$0xff]  ;;  %v242_v50 = vadd.f32 %v226_v19, %v191_v37  ;;  %v190_v51 = vadd.f32 %v174_v21, %v139_v38  ;;  %v223_v57 = vmul.f32 %v437_v10, %v357_v41  ;;  %v120_v59 = vmul.f32 %v419_v4, %v324_v48  ;;  %v34_v3 = vld [vmem:[%s737_s2 + $0x50] sm:$0xff]  ;;  %v49_v5 = vld [vmem:[%s736_s1 + $0x48] sm:$0xff] }
   0xc   :  { %v356_v54 = vld [vmem:[%s736_s1 + $0x1d8] sm:$0xff]  ;;  %v85_v58 = vadd.f32 %v69_v47, %v35_v42  ;;  %v171_v60 = vmul.f32 %v428_v7, %v340_v49  ;;  %v189_v0 = vadd.f32 %v173_v33, %v138_v52  ;;  %v137_v1 = vadd.f32 %v121_v45, %v86_v53  ;;  %v322_v6 = vld [vmem:[%s736_s1 + $0xc8] sm:$0xff]  ;;  %v355_v13 = vld [vmem:[%s736_s1 + $0x1d0] sm:$0xff] }
   0xd   :  { %v258_v62 = vmax.f32 %v242_v50, 0.0  ;;  %v241_v63 = vadd.f32 %v225_v32, %v190_v51  ;;  %v222_v9 = vmul.f32 %v437_v10, %v356_v54  ;;  %v119_v12 = vmul.f32 %v419_v4, %v323_v56  ;;  %v338_v14 = vld [vmem:[%s736_s1 + $0x148] sm:$0xff]  ;;  %v48_v20 = vld [vmem:[%s736_s1 + $0x40] sm:$0xff]  ;;  %v47_v38 = vld [vmem:[%s736_s1 + $0x38] sm:$0xff] }
   0xe   :  { %v136_v8 = vadd.f32 %v120_v59, %v85_v58  ;;  %v240_v16 = vadd.f32 %v224_v44, %v189_v0  ;;  %v188_v17 = vadd.f32 %v172_v46, %v137_v1  ;;  %v170_v18 = vmul.f32 %v428_v7, %v339_v61  ;;  %v33_v19 = vld [vmem:[%s737_s2 + $0x48] sm:$0xff]  ;;  %v321_v26 = vld [vmem:[%s736_s1 + $0xc0] sm:$0xff]  ;;  %v320_v39 = vld [vmem:[%s736_s1 + $0xb8] sm:$0xff] }
   0xf   :  { %265 = vmatpush.msra.mxu0 %v258_v62  ;;  %v257_v15 = vmax.f32 %v241_v63, 0.0  ;;  %v84_v22 = vadd.f32 %v68_v11, %v34_v3  ;;  %v67_v23 = vmul.f32 %v411_v2, %v49_v5  ;;  %v118_v24 = vmul.f32 %v419_v4, %v322_v6  ;;  %v354_v25 = vld [vmem:[%s736_s1 + $0x1c8] sm:$0xff]  ;;  %v337_v27 = vld [vmem:[%s736_s1 + $0x140] sm:$0xff]  ;;  %v336_v40 = vld [vmem:[%s736_s1 + $0x138] sm:$0xff] }
  0x10   :  { %v187_v21 = vadd.f32 %v171_v60, %v136_v8  ;;  %v256_v28 = vmax.f32 %v240_v16, 0.0  ;;  %v239_v29 = vadd.f32 %v223_v57, %v188_v17  ;;  %v221_v30 = vmul.f32 %v437_v10, %v355_v13  ;;  %v32_v32 = vld [vmem:[%s737_s2 + $0x40] sm:$0xff]  ;;  %v31_v45 = vld [vmem:[%s737_s2 + $0x38] sm:$0xff]  ;;  %v46_v46 = vld [vmem:[%s736_s1 + $0x30] sm:$0xff] }
  0x11   :  { %266 = vmatpush.msra.mxu0 %v257_v15  ;;  %v169_v31 = vmul.f32 %v428_v7, %v338_v14  ;;  %v353_v33 = vld [vmem:[%s736_s1 + $0x1c0] sm:$0xff]  ;;  %v135_v35 = vadd.f32 %v119_v12, %v84_v22  ;;  %v83_v36 = vadd.f32 %v67_v23, %v33_v19  ;;  %v66_v37 = vmul.f32 %v411_v2, %v48_v20  ;;  %v352_v51 = vld [vmem:[%s736_s1 + $0x1b8] sm:$0xff]  ;;  %v319_v52 = vld [vmem:[%s736_s1 + $0xb0] sm:$0xff] }
  0x12   :  { %v238_v34 = vadd.f32 %v222_v9, %v187_v21  ;;  %v255_v41 = vmax.f32 %v239_v29, 0.0  ;;  %v220_v42 = vmul.f32 %v437_v10, %v354_v25  ;;  %v117_v43 = vmul.f32 %v419_v4, %v321_v26  ;;  %v335_v53 = vld [vmem:[%s736_s1 + $0x130] sm:$0xff]  ;;  %v45_v0 = vld [vmem:[%s736_s1 + $0x28] sm:$0xff]  ;;  %v44_v16 = vld [vmem:[%s736_s1 + $0x20] sm:$0xff] }
  0x13   :  { %267 = vmatpush.msra.mxu0 %v256_v28  ;;  %v168_v44 = vmul.f32 %v428_v7, %v337_v27  ;;  %v186_v48 = vadd.f32 %v170_v18, %v135_v35  ;;  %v134_v49 = vadd.f32 %v118_v24, %v83_v36  ;;  %v82_v50 = vadd.f32 %v66_v37, %v32_v32  ;;  %v30_v58 = vld [vmem:[%s737_s2 + $0x30] sm:$0xff]  ;;  %v318_v1 = vld [vmem:[%s736_s1 + $0xa8] sm:$0xff]  ;;  %v317_v17 = vld [vmem:[%s736_s1 + $0xa0] sm:$0xff] }
  0x14   :  { %v254_v47 = vmax.f32 %v238_v34, 0.0  ;;  %v219_v54 = vmul.f32 %v437_v10, %v353_v33  ;;  %v65_v55 = vmul.f32 %v411_v2, %v47_v38  ;;  %v116_v56 = vmul.f32 %v419_v4, %v320_v39  ;;  %v351_v63 = vld [vmem:[%s736_s1 + $0x1b0] sm:$0xff]  ;;  %v334_v9 = vld [vmem:[%s736_s1 + $0x128] sm:$0xff]  ;;  %v333_v23 = vld [vmem:[%s736_s1 + $0x120] sm:$0xff] }
  0x15   :  { %268 = vmatpush.msra.mxu0 %v255_v41  ;;  %v167_v57 = vmul.f32 %v428_v7, %v336_v40  ;;  %v237_v59 = vadd.f32 %v221_v30, %v186_v48  ;;  %v185_v60 = vadd.f32 %v169_v31, %v134_v49  ;;  %v133_v61 = vadd.f32 %v117_v43, %v82_v50  ;;  %v29_v15 = vld [vmem:[%s737_s2 + $0x28] sm:$0xff]  ;;  %v28_v28 = vld [vmem:[%s737_s2 + $0x20] sm:$0xff]  ;;  %v43_v29 = vld [vmem:[%s736_s1 + $0x18] sm:$0xff] }
  0x16   :  { %v64_v62 = vmul.f32 %v411_v2, %v46_v46  ;;  %v81_v3 = vadd.f32 %v65_v55, %v31_v45  ;;  %v218_v5 = vmul.f32 %v437_v10, %v352_v51  ;;  %v115_v6 = vmul.f32 %v419_v4, %v319_v52  ;;  %v350_v22 = vld [vmem:[%s736_s1 + $0x1a8] sm:$0xff]  ;;  %v349_v34 = vld [vmem:[%s736_s1 + $0x1a0] sm:$0xff]  ;;  %v316_v35 = vld [vmem:[%s736_s1 + $0x98] sm:$0xff] }
  0x17   :  { %269 = vmatpush.msra.mxu0 %v254_v47  ;;  %v166_v8 = vmul.f32 %v428_v7, %v335_v53  ;;  %v253_v11 = vmax.f32 %v237_v59, 0.0  ;;  %v236_v12 = vadd.f32 %v220_v42, %v185_v60  ;;  %v184_v13 = vadd.f32 %v168_v44, %v133_v61  ;;  %v332_v36 = vld [vmem:[%s736_s1 + $0x118] sm:$0xff]  ;;  %v42_v47 = vld [vmem:[%s736_s1 + $0x10] sm:$0xff]  ;;  %v41_v60 = vld [vmem:[%s736_s1 + $0x8] sm:$0xff] }
  0x18   :  { %v80_v14 = vadd.f32 %v64_v62, %v30_v58  ;;  %v132_v18 = vadd.f32 %v116_v56, %v81_v3  ;;  %v217_v19 = vmul.f32 %v437_v10, %v351_v63  ;;  %v63_v20 = vmul.f32 %v411_v2, %v45_v0  ;;  %v27_v41 = vld [vmem:[%s737_s2 + $0x18] sm:$0xff]  ;;  %v315_v48 = vld [vmem:[%s736_s1 + $0x90] sm:$0xff]  ;;  %v314_v61 = vld [vmem:[%s736_s1 + $0x88] sm:$0xff] }
  0x19   :  { %v114_v21 = vmul.f32 %v419_v4, %v318_v1  ;;  %270 = vmatpush.msra.mxu0 %v253_v11  ;;  %v252_v24 = vmax.f32 %v236_v12, 0.0  ;;  %v235_v25 = vadd.f32 %v219_v54, %v184_v13  ;;  %v165_v27 = vmul.f32 %v428_v7, %v334_v9  ;;  %v348_v46 = vld [vmem:[%s736_s1 + $0x198] sm:$0xff]  ;;  %v26_v53 = vld [vmem:[%s737_s2 + $0x10] sm:$0xff]  ;;  %v330_v3 = vld [vmem:[%s736_s1 + $0x108] sm:$0xff] }
  0x1a   :  { %v131_v26 = vadd.f32 %v115_v6, %v80_v14  ;;  %v183_v30 = vadd.f32 %v167_v57, %v132_v18  ;;  %v79_v31 = vadd.f32 %v63_v20, %v29_v15  ;;  %v62_v32 = vmul.f32 %v411_v2, %v44_v16  ;;  %v331_v54 = vld [vmem:[%s736_s1 + $0x110] sm:$0xff]  ;;  %v25_v11 = vld [vmem:[%s737_s2 + $0x8] sm:$0xff]  ;;  %v40_v12 = vld [vmem:[%s736_s1] sm:$0xff] }
  0x1b   :  { %v113_v33 = vmul.f32 %v419_v4, %v317_v17  ;;  %271 = vmatpush.msra.mxu0 %v252_v24  ;;  %v251_v37 = vmax.f32 %v235_v25, 0.0  ;;  %v216_v39 = vmul.f32 %v437_v10, %v350_v22  ;;  %v164_v40 = vmul.f32 %v428_v7, %v333_v23  ;;  %v347_v59 = vld [vmem:[%s736_s1 + $0x190] sm:$0xff]  ;;  %v313_v13 = vld [vmem:[%s736_s1 + $0x80] sm:$0xff]  ;;  %v346_v18 = vld [vmem:[%s736_s1 + $0x188] sm:$0xff] }
  0x1c   :  { %v182_v38 = vadd.f32 %v166_v8, %v131_v26  ;;  %v234_v42 = vadd.f32 %v218_v5, %v183_v30  ;;  %v130_v43 = vadd.f32 %v114_v21, %v79_v31  ;;  %v78_v44 = vadd.f32 %v62_v32, %v28_v28  ;;  %v24_v24 = vld [vmem:[%s737_s2] sm:$0xff] }
  0x1d   :  { %v61_v45 = vmul.f32 %v411_v2, %v43_v29  ;;  %272 = vmatpush.msra.mxu0 %v251_v37  ;;  %v215_v50 = vmul.f32 %v437_v10, %v349_v34  ;;  %v112_v51 = vmul.f32 %v419_v4, %v316_v35  ;;  %v163_v52 = vmul.f32 %v428_v7, %v332_v36 }
  0x1e   :  { %v233_v49 = vadd.f32 %v217_v19, %v182_v38  ;;  %v250_v55 = vmax.f32 %v234_v42, 0.0  ;;  %v181_v56 = vadd.f32 %v165_v27, %v130_v43  ;;  %v129_v57 = vadd.f32 %v113_v33, %v78_v44  ;;  %v329_v19 = vld [vmem:[%s736_s1 + $0x100] sm:$0xff] }
  0x1f   :  { %v77_v58 = vadd.f32 %v61_v45, %v27_v41  ;;  %v214_v63 = vmul.f32 %v437_v10, %v348_v46  ;;  %v60_v0 = vmul.f32 %v411_v2, %v42_v47  ;;  %v111_v1 = vmul.f32 %v419_v4, %v315_v48  ;;  %v345_v33 = vld [vmem:[%s736_s1 + $0x180] sm:$0xff] }
  0x20   :  { %v249_v62 = vmax.f32 %v233_v49, 0.0  ;;  %273 = vmatpush.msra.mxu0 %v250_v55  ;;  %v232_v5 = vadd.f32 %v216_v39, %v181_v56  ;;  %v180_v6 = vadd.f32 %v164_v40, %v129_v57  ;;  %v162_v9 = vmul.f32 %v428_v7, %v331_v54  ;;  %v22_v47 = vld [vmem:[%s739_s3] sm:$0x1] }
  0x21   :  { %v128_v8 = vadd.f32 %v112_v51, %v77_v58  ;;  %v76_v14 = vadd.f32 %v60_v0, %v26_v53  ;;  %v213_v15 = vmul.f32 %v437_v10, %v347_v59  ;;  %v59_v16 = vmul.f32 %v411_v2, %v41_v60 }
  0x22   :  { %v110_v17 = vmul.f32 %v419_v4, %v314_v61  ;;  %274 = vmatpush.msra.mxu0 %v249_v62  ;;  %v248_v20 = vmax.f32 %v232_v5, 0.0  ;;  %v231_v21 = vadd.f32 %v215_v50, %v180_v6  ;;  %v161_v23 = vmul.f32 %v428_v7, %v330_v3 }
  0x23   :  { %v179_v22 = vadd.f32 %v163_v52, %v128_v8  ;;  %v127_v25 = vadd.f32 %v111_v1, %v76_v14  ;;  %v75_v26 = vadd.f32 %v59_v16, %v25_v11  ;;  %v58_v27 = vmul.f32 %v411_v2, %v40_v12 }
  0x24   :  { %v109_v28 = vmul.f32 %v419_v4, %v313_v13  ;;  %275 = vmatpush.msra.mxu0 %v248_v20  ;;  %v247_v29 = vmax.f32 %v231_v21, 0.0  ;;  %v212_v31 = vmul.f32 %v437_v10, %v346_v18  ;;  %v160_v32 = vmul.f32 %v428_v7, %v329_v19 }
  0x25   :  { %v230_v30 = vadd.f32 %v214_v63, %v179_v22  ;;  %v178_v34 = vadd.f32 %v162_v9, %v127_v25  ;;  %v126_v35 = vadd.f32 %v110_v17, %v75_v26  ;;  %v74_v36 = vadd.f32 %v58_v27, %v24_v24 }
  0x26   :  { %276 = vmatpush.msra.mxu0 %v247_v29  ;;  %v371_v38 = vmov 0   ;;  %v10_v2 = vstv %s738_s4  ;;  %v211_v7 = vmul.f32 %v437_v10, %v345_v33 }
  0x27   :  { %v246_v37 = vmax.f32 %v230_v30, 0.0  ;;  %362 = vset.pattern.permute.xlu0 %v371_v38  ;;  %v229_v4 = vadd.f32 %v213_v15, %v178_v34  ;;  %v177_v39 = vadd.f32 %v161_v23, %v126_v35  ;;  %v125_v40 = vadd.f32 %v109_v28, %v74_v36  ;;  %11 = vst [vmem:[#allocation2] sm:$0x1] %v10_v2 }
  0x29   :  { %277 = vmatpush.msra.mxu0 %v246_v37  ;;  %v245_v41 = vmax.f32 %v229_v4, 0.0  ;;  %v228_v42 = vadd.f32 %v212_v31, %v177_v39  ;;  %v176_v43 = vadd.f32 %v160_v32, %v125_v40 }
  0x2b   :  { %278 = vmatpush.msra.mxu0 %v245_v41  ;;  %v244_v44 = vmax.f32 %v228_v42, 0.0  ;;  %v227_v45 = vadd.f32 %v211_v7, %v176_v43 }
  0x2d   :  { %279 = vmatpush.msra.mxu0 %v244_v44  ;;  %v243_v46 = vmax.f32 %v227_v45, 0.0 }
  0x2e   :  { %v23_v48 = vld [vmem:[#allocation2] sm:$0x1] }
  0x2f   :  { %280 = vmatpush.msra.mxu0 %v243_v46  ;;  %261 = vperm.xlu0 %362, %v23_v48  }
  0x30   :  { %281 = vmatmul.f32.vlgmr.msra.gmra.mxu0 %v22_v47 }
  0xa1   :  { %v262_v49 = vpop.permute.xlu0 %261 }
  0xa2   :  { %v264_v10 = vperm.slane %v262_v49, 0 }
  0xad   :  { %v282_v50 = vpop.f32.mrf.mxu0 }
  0xae   :  { %v283_v51 = vadd.f32 %v282_v50, %v264_v10 }
  0xb0   :  { %v285_v52 = vand.u32 2147483647, %v283_v51  ;;  %vm305_vm4 = vcmp.ge.f32.partialorder %v283_v51, 0.0 }
  0xb2   :  { %v286_v53 = vsub.f32 0.0, %v285_v52 }
  0xb4   :  { %v287_v54 = vmul.f32 1.442695, %v286_v53 }
  0xb6   :  { %367 = vpow2.f32 %v287_v54 }
  0xbc   :  { %v368_v55 = vpop.eup %367 }
  0xbd   :  { %v289_v56 = vadd.f32 1.0, %v368_v55 }
  0xbf   :  { %369 = vrcp.f32 %v289_v56  ;;  %v301_v60 = vand.u32 2147483648, %v289_v56  ;;  %v299_v62 = vand.u32 2147483647, %v289_v56  ;;  %vm295_vm1 = vweird.f32 %v289_v56 }
  0xc1   :  { %v302_v0 = vor.u32 1.1754944e-38, %v301_v60  ;;  %vm300_vm3 = vcmp.eq.f32.partialorder %v299_v62, 8.507059e+37 }
  0xc5   :  { %v370_v57 = vpop.eup %369 }
  0xc6   :  { %v291_v58 = vmul.f32 %v370_v57, %v289_v56  ;;  %vm296_vm0 = vweird.f32 %v370_v57 }
  0xc7   :  { %vm297_vm2 = vmor %vm295_vm1, %vm296_vm0 }
  0xc8   :  { %v292_v59 = vsub.f32 1.0, %v291_v58 }
  0xca   :  { %v293_v61 = vmul.f32 %v370_v57, %v292_v59 }
  0xcc   :  { %v294_v63 = vadd.f32 %v370_v57, %v293_v61 }
  0xce   :  { %v298_v1 = vsel %vm297_vm2, %v370_v57, %v294_v63 }
  0xcf   :  { %v303_v3 = vsel %vm300_vm3, %v302_v0, %v298_v1 }
  0xd0   :  { %v306_v5 = vmul.f32 %v368_v55, %v303_v3 }
  0xd2   :  { %v307_v6 = vsel %vm305_vm4, %v303_v3, %v306_v5 }
  0xd3   :  { %308 = vst [vmem:[%s740_s5] sm:$0x1] %v307_v6 }

</bundles_post_ra>
